<compile_context>
chip_gen: v5e
topology: v5e:2x2
jax: 0.10.0
libtpu: 0.0.40
codegen_flags: <defaults>
</compile_context>

<pallas_src>
import jax
import jax.numpy as jnp
from jax.experimental import pallas as pl
from jax.experimental.pallas import tpu as pltpu


def _sae_fwd_kernel_feat(x_ref, w_enc_ref, w_dec_ref, b_enc_ref, b_dec_ref,
                         dec_ref, enc_ref, acc_ref):
    """Grid point (i, j): batch tile i, feature slab j. Writes encoded slab."""
    j = pl.program_id(1)

    @pl.when(j == 0)
    def _():
        # Fold the decoder bias into the accumulator init.
        acc_ref[...] = jnp.broadcast_to(
            b_dec_ref[...].astype(jnp.float32), acc_ref.shape)

    # Encode this feature slab (b_dec subtraction already folded into b_enc_eff).
    pre = jnp.dot(x_ref[...], w_enc_ref[...],
                  preferred_element_type=jnp.float32) + b_enc_ref[...]
    h = jnp.maximum(pre, 0.0)                       # relu
    enc_ref[...] = h.astype(enc_ref.dtype)

    # Accumulate this slab's decode contribution.
    acc_ref[...] += jnp.dot(h.astype(w_dec_ref.dtype), w_dec_ref[...],
                            preferred_element_type=jnp.float32)

    @pl.when(j == pl.num_programs(1) - 1)
    def _():
        dec_ref[...] = acc_ref[...].astype(dec_ref.dtype)


def _sae_fwd_kernel_nofeat(x_ref, w_enc_ref, w_dec_ref, b_enc_ref, b_dec_ref,
                           dec_ref, acc_ref):
    """Same as above but never writes the encoded activations to HBM."""
    j = pl.program_id(1)

    @pl.when(j == 0)
    def _():
        acc_ref[...] = jnp.broadcast_to(
            b_dec_ref[...].astype(jnp.float32), acc_ref.shape)

    pre = jnp.dot(x_ref[...], w_enc_ref[...],
                  preferred_element_type=jnp.float32) + b_enc_ref[...]
    h = jnp.maximum(pre, 0.0)

    acc_ref[...] += jnp.dot(h.astype(w_dec_ref.dtype), w_dec_ref[...],
                            preferred_element_type=jnp.float32)

    @pl.when(j == pl.num_programs(1) - 1)
    def _():
        dec_ref[...] = acc_ref[...].astype(dec_ref.dtype)


def _largest_divisor_at_most(n, target):
    t = min(n, target)
    while n % t:
        t -= 1
    return t


def topk_orthogonal_sae_forward(acts, W_enc, W_dec, b_enc, b_dec, *,
                                block_b=None, tile_sae=None,
                                output_features=False):
    """Pallas forward. Returns (decoded, encoded, W_dec_normalized) if
    output_features else (decoded, W_dec_normalized)."""
    B, d_in = acts.shape
    d_in_w, d_sae = W_enc.shape
    assert d_in_w == d_in and W_dec.shape == (d_sae, d_in)

    # MXU-aligned batch tile (<= 256), kept < B when possible so the parallel
    # batch axis has >1 step (megacore sharding + pipelining). Larger batch
    # tiles reduce how many times the weight slabs are re-streamed from HBM.
    if block_b is None:
        block_b = _largest_divisor_at_most(B, 256)
        if block_b == B and B > 8:
            block_b = _largest_divisor_at_most(B, max(8, B // 2))
    if tile_sae is None:
        tile_sae = _largest_divisor_at_most(d_sae, 512)
    assert B % block_b == 0 and d_sae % tile_sae == 0

    # Fold the decoder-bias pre-subtraction into the encoder bias.
    b_enc_eff = (b_enc.astype(jnp.float32)
                 - jnp.dot(b_dec.astype(jnp.float32),
                           W_enc.astype(jnp.float32))).reshape(1, d_sae)
    b_dec2 = b_dec.astype(jnp.float32).reshape(1, d_in)

    # Explicit scoped-VMEM budget (v5e default is ~16 MiB; v7x physical 64 MiB).
    w_bytes = jnp.dtype(W_enc.dtype).itemsize
    x_bytes = jnp.dtype(acts.dtype).itemsize
    vmem = (2 * block_b * d_in * x_bytes          # acts tile (double-buffered)
            + 2 * d_in * tile_sae * w_bytes       # W_enc slab
            + 2 * tile_sae * d_in * w_bytes       # W_dec slab
            + 2 * (tile_sae + d_in) * 4           # biases
            + 2 * block_b * d_in * x_bytes        # decoded output tile
            + block_b * d_in * 4)                 # f32 accumulator scratch
    if output_features:
        vmem += 2 * block_b * tile_sae * x_bytes  # encoded output tile
    vmem_limit = min(int(vmem * 1.5) + (1 << 20), 64 << 20)

    n_btiles = B // block_b
    flops = 4 * B * d_in * d_sae                  # two matmuls, 2*M*N*K each
    bytes_accessed = (2 * B * d_in * x_bytes                      # acts + decoded
                      + 2 * n_btiles * d_in * d_sae * w_bytes     # weight re-streams
                      + (B * d_sae * x_bytes if output_features else 0))
    cost = pl.CostEstimate(flops=flops, transcendentals=0,
                           bytes_accessed=bytes_accessed)

    grid = (n_btiles, d_sae // tile_sae)
    in_specs = [
        pl.BlockSpec((block_b, d_in), lambda i, j: (i, 0)),    # acts tile
        pl.BlockSpec((d_in, tile_sae), lambda i, j: (0, j)),   # W_enc slab
        pl.BlockSpec((tile_sae, d_in), lambda i, j: (j, 0)),   # W_dec slab
        pl.BlockSpec((1, tile_sae), lambda i, j: (0, j)),      # b_enc_eff slab
        pl.BlockSpec((1, d_in), lambda i, j: (0, 0)),          # b_dec
    ]
    dec_spec = pl.BlockSpec((block_b, d_in), lambda i, j: (i, 0))
    scratch = [pltpu.VMEM((block_b, d_in), jnp.float32)]
    cparams = pltpu.CompilerParams(
        dimension_semantics=("parallel", "arbitrary"),
        vmem_limit_bytes=vmem_limit)

    if output_features:
        decoded, encoded = pl.pallas_call(
            _sae_fwd_kernel_feat,
            out_shape=(jax.ShapeDtypeStruct((B, d_in), acts.dtype),
                       jax.ShapeDtypeStruct((B, d_sae), acts.dtype)),
            grid_spec=pltpu.PrefetchScalarGridSpec(
                num_scalar_prefetch=0, grid=grid, in_specs=in_specs,
                out_specs=[dec_spec,
                           pl.BlockSpec((block_b, tile_sae),
                                        lambda i, j: (i, j))],
                scratch_shapes=scratch),
            compiler_params=cparams,
            cost_estimate=cost,
        )(acts, W_enc, W_dec, b_enc_eff, b_dec2)
    else:
        decoded = pl.pallas_call(
            _sae_fwd_kernel_nofeat,
            out_shape=jax.ShapeDtypeStruct((B, d_in), acts.dtype),
            grid_spec=pltpu.PrefetchScalarGridSpec(
                num_scalar_prefetch=0, grid=grid, in_specs=in_specs,
                out_specs=dec_spec, scratch_shapes=scratch),
            compiler_params=cparams,
            cost_estimate=cost,
        )(acts, W_enc, W_dec, b_enc_eff, b_dec2)
        encoded = None

    # no_grad parameter side-effect from the PyTorch forward: normalize W_dec
    # over dim=0 (matches torch `norm(dim=0, keepdim=True)`), after decode so
    # it does not affect decoded/encoded. Plain JAX glue.
    W_dec_new = W_dec / (jnp.linalg.norm(W_dec, axis=0, keepdims=True) + 1e-8)

    if output_features:
        return decoded, encoded, W_dec_new
    return decoded, W_dec_new


def _reference_forward(acts, W_enc, W_dec, b_enc, b_dec):
    pre = (acts - b_dec) @ W_enc + b_enc
    enc = jnp.maximum(pre, 0.0)
    dec = enc @ W_dec + b_dec
    return dec, enc


if __name__ == "__main__":
    # Small, lane-aligned shapes consistent with the module's (B, d_in) input.
    B, d_in, d_sae = 16, 128, 256

    key = jax.random.PRNGKey(0)
    k_x, k_we, k_wd, k_be, k_bd = jax.random.split(key, 5)

    acts = jax.random.normal(k_x, (B, d_in), dtype=jnp.float32)
    W_enc = 0.05 * jax.random.normal(k_we, (d_in, d_sae), dtype=jnp.float32)
    W_dec = 0.05 * jax.random.normal(k_wd, (d_sae, d_in), dtype=jnp.float32)
    b_enc = 0.01 * jax.random.normal(k_be, (d_sae,), dtype=jnp.float32)
    b_dec = 0.01 * jax.random.normal(k_bd, (d_in,), dtype=jnp.float32)

    # block_b=8, tile_sae=128 -> grid (2, 2): exercises both the parallel batch
    # axis and the d_sae accumulation axis.
    decoded, encoded, W_dec_norm = topk_orthogonal_sae_forward(
        acts, W_enc, W_dec, b_enc, b_dec,
        block_b=8, tile_sae=128, output_features=True)
    jax.block_until_ready((decoded, encoded, W_dec_norm))

    dec_ref, enc_ref = _reference_forward(acts, W_enc, W_dec, b_enc, b_dec)
    assert jnp.allclose(decoded, dec_ref, atol=1e-5, rtol=1e-5)
    assert jnp.allclose(encoded, enc_ref, atol=1e-5, rtol=1e-5)

    # output_features=False path (no encoded HBM write).
    decoded_only, W_dec_norm2 = topk_orthogonal_sae_forward(
        acts, W_enc, W_dec, b_enc, b_dec,
        block_b=8, tile_sae=128, output_features=False)
    jax.block_until_ready((decoded_only, W_dec_norm2))
    assert jnp.allclose(decoded_only, dec_ref, atol=1e-5, rtol=1e-5)

    w_ref = W_dec / (jnp.linalg.norm(W_dec, axis=0, keepdims=True) + 1e-8)
    assert jnp.allclose(W_dec_norm, w_ref, atol=1e-6, rtol=1e-6)

    # TODO(synk): get_top_pairs / orthogonality_loss (top-k over the d_sae^2
    # feature-pair matrix) are training-loss utilities not called by forward();
    # not kernelized here.

    print("KERNEL_OK")
</pallas_src>

<mosaic_0001>
module attributes {stable_mosaic.version = 11 : i64} {
  func.func @_sae_fwd_kernel_feat(%arg0: i32, %arg1: i32, %arg2: memref<8x128xf32, #tpu.memory_space<vmem>>, %arg3: memref<128x128xf32, #tpu.memory_space<vmem>>, %arg4: memref<128x128xf32, #tpu.memory_space<vmem>>, %arg5: memref<1x128xf32, #tpu.memory_space<vmem>>, %arg6: memref<1x128xf32, #tpu.memory_space<vmem>>, %arg7: memref<8x128xf32, #tpu.memory_space<vmem>>, %arg8: memref<8x128xf32, #tpu.memory_space<vmem>>, %arg9: memref<8x128xf32, #tpu.memory_space<vmem>>) attributes {dimension_semantics = [#tpu.dimension_semantics<parallel>, #tpu.dimension_semantics<arbitrary>], iteration_bounds = array<i64: 2, 2>, scalar_prefetch = 0 : i64, scratch_operands = 1 : i64, tpu.core_type = #tpu.core_type<tc>, window_params = [{transform_indices = @transform_0, window_bounds = array<i64: 8, 128>}, {transform_indices = @transform_1, window_bounds = array<i64: 128, 128>}, {transform_indices = @transform_2, window_bounds = array<i64: 128, 128>}, {transform_indices = @transform_3, window_bounds = array<i64: 1, 128>}, {pipeline_mode = #tpu.pipeline_mode<synchronous>, transform_indices = @transform_4, window_bounds = array<i64: 1, 128>}, {transform_indices = @transform_5, window_bounds = array<i64: 8, 128>}, {transform_indices = @transform_6, window_bounds = array<i64: 8, 128>}]} {
    %c0_i32 = arith.constant 0 : i32
    %0 = arith.cmpi eq, %arg1, %c0_i32 : i32
    %1 = arith.extui %0 : i1 to i32
    %c0_i32_0 = arith.constant 0 : i32
    %2 = arith.cmpi ne, %1, %c0_i32_0 : i32
    scf.if %2 {
      %c0_17 = arith.constant 0 : index
      %c0_18 = arith.constant 0 : index
      %20 = vector.load %arg6[%c0_17, %c0_18] : memref<1x128xf32, #tpu.memory_space<vmem>>, vector<1x128xf32>
      %21 = vector.shape_cast %20 : vector<1x128xf32> to vector<1x128xf32>
      %22 = vector.broadcast %21 : vector<1x128xf32> to vector<8x128xf32>
      %c0_19 = arith.constant 0 : index
      %c0_20 = arith.constant 0 : index
      %23 = vector.load %arg9[%c0_19, %c0_20] : memref<8x128xf32, #tpu.memory_space<vmem>>, vector<8x128xf32>
      tpu.vector_store %arg9[%c0_19, %c0_20], %22 {strides = array<i32>} : memref<8x128xf32, #tpu.memory_space<vmem>>, vector<8x128xf32>,
    } else {
    }
    %c0 = arith.constant 0 : index
    %c0_1 = arith.constant 0 : index
    %3 = vector.load %arg2[%c0, %c0_1] : memref<8x128xf32, #tpu.memory_space<vmem>>, vector<8x128xf32>
    %c0_2 = arith.constant 0 : index
    %c0_3 = arith.constant 0 : index
    %4 = vector.load %arg3[%c0_2, %c0_3] : memref<128x128xf32, #tpu.memory_space<vmem>>, vector<128x128xf32>
    %cst = arith.constant dense<0.000000e+00> : vector<8x128xf32>
    %5 = tpu.matmul %3, %4, %cst {dimension_numbers = #tpu.dot_dimension_numbers<[1], [0], [0], [1], [0, 0, 1, 1], [], []>} : vector<8x128xf32>, vector<128x128xf32>, vector<8x128xf32> -> vector<8x128xf32>
    %c0_4 = arith.constant 0 : index
    %c0_5 = arith.constant 0 : index
    %6 = vector.load %arg5[%c0_4, %c0_5] : memref<1x128xf32, #tpu.memory_space<vmem>>, vector<1x128xf32>
    %7 = vector.broadcast %6 : vector<1x128xf32> to vector<8x128xf32>
    %8 = arith.addf %5, %7 : vector<8x128xf32>
    %cst_6 = arith.constant 0.000000e+00 : f32
    %9 = vector.broadcast %cst_6 : f32 to vector<8x128xf32>
    %10 = arith.maximumf %8, %9 : vector<8x128xf32>
    %c0_7 = arith.constant 0 : index
    %c0_8 = arith.constant 0 : index
    %11 = vector.load %arg8[%c0_7, %c0_8] : memref<8x128xf32, #tpu.memory_space<vmem>>, vector<8x128xf32>
    tpu.vector_store %arg8[%c0_7, %c0_8], %10 {strides = array<i32>} : memref<8x128xf32, #tpu.memory_space<vmem>>, vector<8x128xf32>,
    %c0_9 = arith.constant 0 : index
    %c0_10 = arith.constant 0 : index
    %12 = vector.load %arg9[%c0_9, %c0_10] : memref<8x128xf32, #tpu.memory_space<vmem>>, vector<8x128xf32>
    %c0_11 = arith.constant 0 : index
    %c0_12 = arith.constant 0 : index
    %13 = vector.load %arg4[%c0_11, %c0_12] : memref<128x128xf32, #tpu.memory_space<vmem>>, vector<128x128xf32>
    %cst_13 = arith.constant dense<0.000000e+00> : vector<8x128xf32>
    %14 = tpu.matmul %10, %13, %cst_13 {dimension_numbers = #tpu.dot_dimension_numbers<[1], [0], [0], [1], [0, 0, 1, 1], [], []>} : vector<8x128xf32>, vector<128x128xf32>, vector<8x128xf32> -> vector<8x128xf32>
    %15 = arith.addf %12, %14 : vector<8x128xf32>
    %c0_14 = arith.constant 0 : index
    %c0_15 = arith.constant 0 : index
    %16 = vector.load %arg9[%c0_14, %c0_15] : memref<8x128xf32, #tpu.memory_space<vmem>>, vector<8x128xf32>
    tpu.vector_store %arg9[%c0_14, %c0_15], %15 {strides = array<i32>} : memref<8x128xf32, #tpu.memory_space<vmem>>, vector<8x128xf32>,
    %c1_i32 = arith.constant 1 : i32
    %17 = arith.cmpi eq, %arg1, %c1_i32 : i32
    %18 = arith.extui %17 : i1 to i32
    %c0_i32_16 = arith.constant 0 : i32
    %19 = arith.cmpi ne, %18, %c0_i32_16 : i32
    scf.if %19 {
      %c0_17 = arith.constant 0 : index
      %c0_18 = arith.constant 0 : index
      %20 = vector.load %arg9[%c0_17, %c0_18] : memref<8x128xf32, #tpu.memory_space<vmem>>, vector<8x128xf32>
      %c0_19 = arith.constant 0 : index
      %c0_20 = arith.constant 0 : index
      %21 = vector.load %arg7[%c0_19, %c0_20] : memref<8x128xf32, #tpu.memory_space<vmem>>, vector<8x128xf32>
      tpu.vector_store %arg7[%c0_19, %c0_20], %20 {strides = array<i32>} : memref<8x128xf32, #tpu.memory_space<vmem>>, vector<8x128xf32>,
    } else {
    }
    return
  }
  func.func @transform_0(%arg0: i32, %arg1: i32) -> (i32, i32) {
    %c0_i32 = arith.constant 0 : i32
    %c0_i32_0 = arith.constant 0 : i32
    return %arg0, %c0_i32 : i32, i32
  }
  func.func @transform_1(%arg0: i32, %arg1: i32) -> (i32, i32) {
    %c0_i32 = arith.constant 0 : i32
    %c0_i32_0 = arith.constant 0 : i32
    return %c0_i32, %arg1 : i32, i32
  }
  func.func @transform_2(%arg0: i32, %arg1: i32) -> (i32, i32) {
    %c0_i32 = arith.constant 0 : i32
    %c0_i32_0 = arith.constant 0 : i32
    return %arg1, %c0_i32 : i32, i32
  }
  func.func @transform_3(%arg0: i32, %arg1: i32) -> (i32, i32) {
    %c0_i32 = arith.constant 0 : i32
    %c0_i32_0 = arith.constant 0 : i32
    return %c0_i32, %arg1 : i32, i32
  }
  func.func @transform_4(%arg0: i32, %arg1: i32) -> (i32, i32) {
    %c0_i32 = arith.constant 0 : i32
    %c0_i32_0 = arith.constant 0 : i32
    %c0_i32_1 = arith.constant 0 : i32
    return %c0_i32, %c0_i32_0 : i32, i32
  }
  func.func @transform_5(%arg0: i32, %arg1: i32) -> (i32, i32) {
    %c0_i32 = arith.constant 0 : i32
    %c0_i32_0 = arith.constant 0 : i32
    return %arg0, %c0_i32 : i32, i32
  }
  func.func @transform_6(%arg0: i32, %arg1: i32) -> (i32, i32) {
    %c0_i32 = arith.constant 0 : i32
    return %arg0, %arg1 : i32, i32
  }
}

</mosaic_0001>

<bundles_post_ra>
// kernel: tpu_custom_call.1
= control target key start
LH: loop header
LB: loop body
LE: loop exit
PB: predicated region body
PF: predicated region fallthrough
CT: control target
= control target key end

     0   :  { %s1558_s0 = inlined_call_operand.hbm [shape: f32[16,128], index: 0, kind: input, shape index: {}]   ;;  %s1559_s1 = inlined_call_operand.hbm [shape: f32[128,256], index: 1, kind: input, shape index: {}]   ;;  %s1560_s2 = inlined_call_operand.hbm [shape: f32[256,128], index: 2, kind: input, shape index: {}]   ;;  %s1561_s3 = inlined_call_operand.vmem [shape: f32[1,256], index: 3, kind: input, shape index: {}]   ;;  %s1562_s4 = inlined_call_operand.vmem [shape: f32[1,128], index: 4, kind: input, shape index: {}]   ;;  %s1563_s5 = inlined_call_operand.hbm [shape: f32[16,128], index: 5, kind: output, shape index: {0}]   ;;  %s1564_s6 = inlined_call_operand.hbm [shape: f32[16,256], index: 6, kind: output, shape index: {1}]  }
   0x1   :  { %1587 = sst [smem:[#allocation33_spill]] %s1559_s1 }
   0x2   :  { %1588 = sst [smem:[#allocation34_spill]] %s1561_s3 }
   0x3   :  { %1589 = sst [smem:[#allocation35_spill]] %s1562_s4 }
   0x4   :  { %1590 = sst [smem:[#allocation36_spill]] %s1563_s5 }
   0x5   :  { %1591 = sst [smem:[#allocation37_spill]] %s1564_s6 }
   0x6   :  { %12 = vsyncpa [#allocation4], 0 }
   0x7   :  { %14 = vsyncpa [#allocation4 + $0x1], 0 }
   0x8   :  { %15 = vsyncpa [#allocation7], 0 }
   0x9   :  { %17 = vsyncpa [#allocation7 + $0x1], 0 }
   0xa   :  { %18 = vsyncpa [#allocation5], 0 }
   0xb   :  { %20 = vsyncpa [#allocation5 + $0x1], 0 }
   0xc   :  { %21 = vsyncpa [#allocation11], 0 }
   0xd   :  { %23 = vsyncpa [#allocation11 + $0x1], 0  ;;  %s1176_s21 = smov 0   ;;  %s1178_s22 = smov 0  }
   0xe   :  { %s1180_s23 = smov 0   ;;  %s1182_s24 = smov 0  }
   0xf   :  { %s1184_s25 = smov 0   ;;  %s1186_s26 = smov 0  }
  0x10   :  { %s1188_s27 = smov 0   ;;  %s1190_s28 = smov 0  }
  0x11   :  { %s1192_s29 = smov 0   ;;  %s1194_s30 = smov 0  }
  0x12   :  { %s1196_s7 = smov 0   ;;  %s1198_s8 = smov 0  }
  0x13   :  { %s1200_s9 = smov 0   ;;  %s1202_s10 = smov 0  }
  0x14 LB: > { %1592 = sst [smem:[#allocation16_spill]] %s1084_s21  ;;  %p56_p0 = scmp.eq.s32.totalorder %s1136_s10, 0  ;;  %s1136_s10 = sphi %s1202_s10, %s29_s10   ;;  %s1132_s9 = sphi %s1200_s9, %s1648_s9   ;;  %s1128_s8 = sphi %s1198_s8, %s1657_s8   ;;  %s1124_s7 = sphi %s1196_s7, %s1646_s7   ;;  %s1120_s30 = sphi %s1194_s30, %s1656_s30   ;;  %s1116_s29 = sphi %s1192_s29, %s1645_s29   ;;  %s1112_s28 = sphi %s1190_s28, %s1655_s28   ;;  %s1108_s27 = sphi %s1188_s27, %s1654_s27   ;;  %s1104_s26 = sphi %s1186_s26, %s1643_s26   ;;  %s1100_s25 = sphi %s1184_s25, %s1653_s25   ;;  %s1096_s24 = sphi %s1182_s24, %s1652_s24   ;;  %s1092_s23 = sphi %s1180_s23, %s1641_s23   ;;  %s1088_s22 = sphi %s1178_s22, %s1651_s22   ;;  %s1084_s21 = sphi %s1176_s21, %s1650_s21  }
  0x15   : > { %1593 = sst [smem:[#allocation17_spill]] %s1092_s23  ;;  %p81_p1 = scmp.ne.s32.totalorder %s1104_s26, %s1100_s25 }
  0x16   : > { %1594 = sst [smem:[#allocation18_spill]] %s1104_s26  ;;  %p1571_p2 = scmp.lt.s32.totalorder %s1136_s10, 4 }
  0x17   : > { %1595 = sst [smem:[#allocation19_spill]] %s1108_s27  ;;  %s260_s12 = sand.u32 1, %s1136_s10  }
  0x18   : > { %1596 = sst [smem:[#allocation20_spill]] %s1116_s29  ;;  %p83_p3 = por %p81_p1, %p56_p0 }
  0x19   : > { %1597 = sst [smem:[#allocation21_spill]] %s1120_s30  ;;  %s262_s13 = sand.u32 1, %s1104_s26  }
  0x1a   : > { %1598 = sst [smem:[#allocation22_spill]] %s1124_s7  ;;  %s698_s14 = sshll.u32 %s1128_s8, 3 }
  0x1b   : > { %1599 = sst [smem:[#allocation23_spill]] %s1132_s9  ;;  %s1256_s15 = sshll.u32 %s262_s13, 7 }
  0x1c   : > { %s1600_s1 = sld [smem:[#allocation33_spill]]  ;;  %s264_s20 = scalar_lea.vmem [#allocation6], %s1256_s15 }
  0x1d   : > { %s271_s11 = sshll.u32 %s264_s20, 4  ;;  %p1264_p4 = pnand %p1571_p2, %p83_p3  ;;  %s272_s11 = int_to_ptr.vmem [resolvable:$true] %s271_s11 }
  0x1e   : > { %s1268_s16 = scalar_lea.sflag [#allocation7], %s260_s12  ;;  %s1567_s17 = smov 128  }
  0x1f   : > { %p702_p5 = scmp.ge.s32.totalorder %s1136_s10, 1  ;;  %p307_p6 = scmp.lt.s32.totalorder %s1136_s10, 5 }
  0x20   : > { %s1282_s20 = sadd.s32 4294967295, %s1136_s10   ;;  %s38_s6 = sadd.s32 1, %s1128_s8 }
  0x21   : > { %p1277_p7 = pnand %p702_p5, %p307_p6  ;;  %p39_p8 = scmp.ge.s32.totalorder %s38_s6, 2 }
  0x22   : > { %s268_s18 = scalar_lea.hbm %s1600_s1, %s698_s14  ;;  %s1138_s14 = smov 256  }
  0x23   : > { %s269_s19 = sshll.u32 %s268_s18, 4  ;;  %s1568_s18 = smov 8   ;;  %s270_s19 = int_to_ptr.hbm [resolvable:$true] %s269_s19 }
  0x24   : > { %734 = dma.hbm_to_vmem [thread:$0]  (!%p1264_p4), %s270_s19, 2048, %s272_s11, %s1268_s16, %s1138_s14, %s1567_s17, %s1568_s18  }
  0x25   : > { %s692_s1 = sadd.s32 4294967294, %s1136_s10   ;;  %s41_s5 = sadd.s32 1, %s1132_s9 }
  0x26   : > { %s48_s11 = sadd.s32 1, %s1116_s29  ;;  %p55_p9 = scmp.ne.s32.totalorder %s1116_s29, %s1112_s28 }
  0x27   : > { %s1659_s6 = smov (%p39_p8, %s38_s6), 0  ;;  %s1661_s5 = smov (!%p39_p8, %s41_s5), %s1132_s9 }
  0x28   : > { %1603 = sst [smem:[#allocation24_spill]] %s1659_s6  ;;  %p1298_p10 = por %p56_p0, %p55_p9 }
  0x29   : > { %p61_p11 = scmp.ne.s32.totalorder %s1112_s28, %s1108_s27  ;;  %p43_p12 = scmp.ge.s32.totalorder %s1661_s5, 2 }
  0x2a   : > { %p62_p13 = scmp.eq.s32.totalorder %s1282_s20, 0  ;;  %s71_s14 = ssub.s32 %s1128_s8, %s1659_s6 }
  0x2b   : > { %p87_p1 = scmp.ne.s32.totalorder %s1100_s25, %s1096_s24  ;;  %s1663_s5 = smov (%p43_p12, %s1661_s5), 0 }
  0x2c   : > { %1605 = sst [smem:[#allocation25_spill]] %s1663_s5  ;;  %p1314_p0 = por %p62_p13, %p61_p11 }
  0x2d   : > { %p72_p3 = scmp.eq.s32.totalorder %s71_s14, 0  ;;  %s45_s18 = ssub.s32 %s1132_s9, %s1663_s5 }
  0x2e   : > { %p1320_p5 = por %p87_p1, %p62_p13  ;;  %p46_p6 = scmp.eq.s32.totalorder %s45_s18, 0 }
  0x2f   : > { %p184_p8 = scmp.eq.s32.totalorder %s1282_s20, 3  ;;  %s1609_s24 = sadd.s32 1, %s1104_s26 }
  0x30   : > { %s1607_s7 = scalar_select %p1320_p5, 1, 0 }
  0x31   : > { %s1328_s6 = scalar_select %p72_p3, %s1104_s26, %s1609_s24  }
  0x32   : > { %1608 = sst [smem:[#allocation26_spill]] %s1607_s7  ;;  %p1336_p12 = por %p184_p8, %p55_p9 }
  0x33   : > { %1610 = sst [smem:[#allocation27_spill]] %s1328_s6  ;;  %p190_p2 = scmp.eq.s32.totalorder %s692_s1, 3 }
  0x34   : > { %s1331_s4 = scalar_select %p46_p6, %s1116_s29, %s48_s11  }
  0x35   : > { %s1612_s3 = scalar_select %p1336_p12, 1, 0 }
  0x36   : > { %1611 = sst [smem:[#allocation28_spill]] %s1331_s4  ;;  %s198_s5 = sor.u32 %s71_s14, %s45_s18 }
  0x37   : > { %s201_s30 = sadd.s32 1, %s1092_s23  ;;  %p1344_p13 = por %p190_p2, %p61_p11 }
  0x38   : > { %p199_p1 = scmp.eq.s32.totalorder %s198_s5, 0  ;;  %p211_p3 = scmp.ne.s32.totalorder %s1092_s23, %s1088_s22 }
  0x39   : > { %s1613_s7 = scalar_select %p1344_p13, 1, 0 }
  0x3a   : > { %p217_p6 = scmp.ne.s32.totalorder %s1088_s22, %s1084_s21  ;;  %p1355_p9 = por %p211_p3, %p184_p8 }
  0x3b   : > { %1614 = sst [smem:[#allocation29_spill]] %s1613_s7  ;;  %s241_s18 = sand.u32 1, %s1116_s29  }
  0x3c   : > { %s1353_s11 = scalar_select %p199_p1, %s1092_s23, %s201_s30  }
  0x3d   : > { %s1616_s24 = scalar_select %p1355_p9, 1, 0 }
  0x3e   : > { %1615 = sst [smem:[#allocation30_spill]] %s1353_s11  ;;  %p1359_p12 = por %p217_p6, %p190_p2 }
  0x3f   : > { %1617 = sst [smem:[#allocation31_spill]] %s1616_s24  ;;  %s696_s14 = sshll.u32 %s1132_s9, 3 }
  0x40   : > { %s1618_s1 = scalar_select %p1359_p12, 1, 0 }
  0x41   : > { %s695_s4 = sshll.u32 %s241_s18, 3  ;;  %s249_s5 = scalar_lea.hbm %s1558_s0, %s696_s14 }
  0x42   : > { %1619 = sst [smem:[#allocation32_spill]] %s1618_s1  ;;  %s251_s21 = sshll.u32 %s249_s5, 4  ;;  %s252_s21 = int_to_ptr.hbm [resolvable:$true] %s251_s21 }
  0x43   : > { %s245_s30 = scalar_lea.vmem [#allocation3], %s695_s4  ;;  %p1620_p11 = scmp.lt.s32.totalorder %s1136_s10, 4 }
  0x44   : > { %s253_s11 = sshll.u32 %s245_s30, 4  ;;  %s717_s23 = sshll.u32 %s1128_s8, 7  ;;  %s254_s11 = int_to_ptr.vmem [resolvable:$true] %s253_s11 }
  0x45   : > { %p729_p2 = pnand %p1620_p11, %p1298_p10  ;;  %s285_s7 = scalar_lea.vmem [#allocation8], %s1256_s15 }
  0x46   : > { %s293_s1 = sshll.u32 %s285_s7, 4  ;;  %s290_s27 = scalar_lea.hbm %s1560_s2, %s717_s23  ;;  %s294_s1 = int_to_ptr.vmem [resolvable:$true] %s293_s1 }
  0x47   : > { %s242_s24 = scalar_lea.sflag [#allocation4], %s241_s18  ;;  %s291_s6 = sshll.u32 %s290_s27, 4  ;;  %s292_s6 = int_to_ptr.hbm [resolvable:$true] %s291_s6 }
  0x48   : > { %731 = dma.hbm_to_vmem [thread:$0]  (!%p729_p2), %s252_s21, 128, %s254_s11, %s242_s24  }
  0x49   : > { %s1621_s4 = smov 8   ;;  %s1622_s26 = smov 128  }
  0x4a   : > { %737 = dma.hbm_to_vmem [thread:$0]  (!%p1264_p4), %s292_s6, 2048, %s294_s1, %s1268_s16, %s1622_s26, %s1622_s26, %s1621_s4  }
  0x4b   : > { %311 = sbr.rel (%p1277_p7) target bundleno = 442 (0x1ba), region = 40  ;;  %s1386_s7 = sand.u32 (!%p1277_p7), 1, %s1112_s28  }
  0x4c   : > { %s703_s23 = sshll.u32 (!%p1277_p7), %s1386_s7, 3  ;;  %s314_s29 = scalar_lea.sflag (!%p1277_p7), [#allocation4], %s1386_s7 }
  0x4d   : > { %s1390_s21 = scalar_lea.vmem (!%p1277_p7), [#allocation3], %s703_s23 }
  0x50   : > { %1067 = dma.done.wait (%p1314_p0), %s314_s29, 128  }
  0x51   : > { %1069 = vsyncadd (%p1314_p0), %s314_s29, 4294967168  ;;  %s323_s9 = sand.u32 1, %s1282_s20   ;;  %s325_s15 = sand.u32 1, %s1100_s25  }
  0x52   : > { %s704_s13 = sshll.u32 %s325_s15, 7  ;;  %s324_s16 = scalar_lea.sflag [#allocation7], %s323_s9 }
  0x53   : > { %s1398_s12 = scalar_lea.vmem [#allocation6], %s704_s13 }
  0x54   : > { %1071 = dma.done.wait (%p1320_p5), %s324_s16, 4096  }
  0x55   : > { %1073 = vsyncadd (%p1320_p5), %s324_s16, 4294963200  ;;  %s1624_s19 = sld [smem:[#allocation21_spill]]  ;;  %s382_s17 = sand.u32 1, %s1088_s22  }
  0x56   : > { %s1408_s11 = sshll.u32 %s382_s17, 3  ;;  %s1625_s18 = sld [smem:[#allocation34_spill]] }
  0x57   : > { %s1417_s5 = scalar_lea.vmem [#allocation8], %s704_s13  ;;  %s1419_s30 = scalar_lea.vmem [#allocation9], %s703_s23 }
  0x58   : > { %s384_s6 = scalar_lea.vmem [#allocation10], %s1408_s11 }
  0x5b   : > { %p386_p4 = scmp.lt.s32.totalorder %s1624_s19, 1  ;;  %p708_p7 = scmp.ne.s32.totalorder %s1624_s19, 0 }
  0x5c   : > { %s1626_s29 = sld [smem:[#allocation35_spill]] (!%p708_p7) }
  0x5d   : > { %s1411_s20 = scalar_select %p386_p4, %s1624_s19, 1 }
  0x5e   : > { %392 = sbr.rel (%p708_p7) target bundleno = 101 (0x65), region = 56 }
  0x5f   : > { %s388_s14 = scalar_lea.vmem %s1625_s18, %s1411_s20 }
  0x63   : > { %v862_v0 = vld [vmem:[%s1626_s29] ss:$0 sm:$0xff] }
  0x64   : > { %397 = vst [vmem:[#allocation2] sm:$0xff] %v862_v0 }
  0x65 PF: > { %v414_v1 = vld [vmem:[%s1398_s12 + $0x78] sm:$0xff]  ;;  %v413_v2 = vld [vmem:[%s1398_s12 + $0x70] sm:$0xff]  ;;  %v412_v3 = vld [vmem:[%s1398_s12 + $0x68] sm:$0xff] }
  0x66   : > { %419 = vmatpush.msra.mxu0 %v414_v1  ;;  %v411_v4 = vld [vmem:[%s1398_s12 + $0x60] sm:$0xff]  ;;  %v457_v5 = vld [vmem:[%s1417_s5 + $0x78] sm:$0xff]  ;;  %v456_v7 = vld [vmem:[%s1417_s5 + $0x70] sm:$0xff] }
  0x67   : > { %v410_v6 = vld [vmem:[%s1398_s12 + $0x58] sm:$0xff]  ;;  %458 = vmatpush.msra.mxu1 %v457_v5  ;;  %v455_v8 = vld [vmem:[%s1417_s5 + $0x68] sm:$0xff]  ;;  %v409_v9 = vld [vmem:[%s1398_s12 + $0x50] sm:$0xff] }
  0x68   : > { %420 = vmatpush.msra.mxu0 %v413_v2  ;;  %v454_v10 = vld [vmem:[%s1417_s5 + $0x60] sm:$0xff]  ;;  %v408_v11 = vld [vmem:[%s1398_s12 + $0x48] sm:$0xff]  ;;  %v453_v12 = vld [vmem:[%s1417_s5 + $0x58] sm:$0xff] }
  0x69   : > { %459 = vmatpush.msra.mxu1 %v456_v7  ;;  %v407_v13 = vld [vmem:[%s1398_s12 + $0x40] sm:$0xff]  ;;  %v452_v14 = vld [vmem:[%s1417_s5 + $0x50] sm:$0xff]  ;;  %v406_v15 = vld [vmem:[%s1398_s12 + $0x38] sm:$0xff] }
  0x6a   : > { %421 = vmatpush.msra.mxu0 %v412_v3  ;;  %v451_v16 = vld [vmem:[%s1417_s5 + $0x48] sm:$0xff]  ;;  %v405_v17 = vld [vmem:[%s1398_s12 + $0x30] sm:$0xff]  ;;  %v450_v18 = vld [vmem:[%s1417_s5 + $0x40] sm:$0xff] }
  0x6b   : > { %460 = vmatpush.msra.mxu1 %v455_v8  ;;  %v404_v19 = vld [vmem:[%s1398_s12 + $0x28] sm:$0xff]  ;;  %v449_v20 = vld [vmem:[%s1417_s5 + $0x38] sm:$0xff]  ;;  %v403_v21 = vld [vmem:[%s1398_s12 + $0x20] sm:$0xff] }
  0x6c   : > { %422 = vmatpush.msra.mxu0 %v411_v4  ;;  %v448_v22 = vld [vmem:[%s1417_s5 + $0x30] sm:$0xff]  ;;  %v402_v23 = vld [vmem:[%s1398_s12 + $0x18] sm:$0xff]  ;;  %v447_v24 = vld [vmem:[%s1417_s5 + $0x28] sm:$0xff] }
  0x6d   : > { %461 = vmatpush.msra.mxu1 %v454_v10  ;;  %v401_v25 = vld [vmem:[%s1398_s12 + $0x10] sm:$0xff]  ;;  %v446_v26 = vld [vmem:[%s1417_s5 + $0x20] sm:$0xff]  ;;  %v400_v27 = vld [vmem:[%s1398_s12 + $0x8] sm:$0xff] }
  0x6e   : > { %423 = vmatpush.msra.mxu0 %v410_v6  ;;  %v445_v28 = vld [vmem:[%s1417_s5 + $0x18] sm:$0xff]  ;;  %v399_v29 = vld [vmem:[%s1398_s12] sm:$0xff]  ;;  %v444_v31 = vld [vmem:[%s1417_s5 + $0x10] sm:$0xff] }
  0x6f   : > { %462 = vmatpush.msra.mxu1 %v453_v12  ;;  %v398_v30 = vld [vmem:[%s1390_s21] sm:$0xff]  ;;  %v443_v32 = vld [vmem:[%s1417_s5 + $0x8] sm:$0xff]  ;;  %v442_v33 = vld [vmem:[%s1417_s5] sm:$0xff]  ;;  %s1628_s21 = sld [smem:[#allocation21_spill]] }
  0x70   : > { %424 = vmatpush.msra.mxu0 %v409_v9  ;;  %v863_v34 = vld [vmem:[%s388_s14] ss:$0 sm:$0xff] }
  0x71   : > { %463 = vmatpush.msra.mxu1 %v452_v14  ;;  %v441_v38 = vld [vmem:[#allocation2] sm:$0xff] }
  0x72   : > { %425 = vmatpush.msra.mxu0 %v408_v11 }
  0x73   : > { %464 = vmatpush.msra.mxu1 %v451_v16 }
  0x74   : > { %426 = vmatpush.msra.mxu0 %v407_v13 }
  0x75   : > { %465 = vmatpush.msra.mxu1 %v450_v18  ;;  %p709_p10 = scmp.ne.s32.totalorder %s1628_s21, 1 }
  0x76   : > { %427 = vmatpush.msra.mxu0 %v406_v15 }
  0x77   : > { %466 = vmatpush.msra.mxu1 %v449_v20 }
  0x78   : > { %428 = vmatpush.msra.mxu0 %v405_v17 }
  0x79   : > { %467 = vmatpush.msra.mxu1 %v448_v22 }
  0x7a   : > { %429 = vmatpush.msra.mxu0 %v404_v19 }
  0x7b   : > { %468 = vmatpush.msra.mxu1 %v447_v24 }
  0x7c   : > { %430 = vmatpush.msra.mxu0 %v403_v21 }
  0x7d   : > { %469 = vmatpush.msra.mxu1 %v446_v26 }
  0x7e   : > { %431 = vmatpush.msra.mxu0 %v402_v23 }
  0x7f   : > { %470 = vmatpush.msra.mxu1 %v445_v28 }
  0x80   : > { %432 = vmatpush.msra.mxu0 %v401_v25 }
  0x81   : > { %471 = vmatpush.msra.mxu1 %v444_v31 }
  0x82   : > { %433 = vmatpush.msra.mxu0 %v400_v27 }
  0x83   : > { %472 = vmatpush.msra.mxu1 %v443_v32 }
  0x84   : > { %434 = vmatpush.msra.mxu0 %v399_v29 }
  0x85   : > { %435 = vmatmul.f32.vlgmr.msra.gmra.mxu0 %v398_v30  ;;  %473 = vmatpush.msra.mxu1 %v442_v33 }
 0x102   : > { %v436_v35 = vpop.f32.mrf.mxu0 }
 0x103   : > { %v437_v36 = vadd.f32 %v863_v34, %v436_v35 }
 0x105   : > { %v439_v37 = vmax.f32 %v437_v36, 0.0 }
 0x107   : > { %440 = vst [vmem:[%s384_s6] sm:$0xff] %v439_v37  ;;  %474 = vmatmul.f32.vlgmr.msra.gmra.mxu1 %v439_v37 }
 0x183   : > { %483 = sbr.rel (%p709_p10) target bundleno = 400 (0x190), region = 60 }
 0x184   : > { %v475_v39 = vpop.f32.mrf.mxu1 }
 0x185   : > { %v478_v40 = vadd.f32 %v475_v39, %v441_v38 }
 0x187   : > { %479 = vst [vmem:[#allocation2] sm:$0xff] %v478_v40 }
 0x18e   : > { %v484_v41 = vld [vmem:[#allocation2] sm:$0xff] }
 0x18f   : > { %485 = vst [vmem:[%s1419_s30] sm:$0xff] %v484_v41 }
 0x190 PF: > { %s1629_s15 = sld [smem:[#allocation22_spill]]  ;;  %s504_s24 = sshll.u32 %s1419_s30, 4  ;;  %s505_s24 = int_to_ptr.vmem [resolvable:$true] %s504_s24 }
 0x191   : > { %s1630_s19 = sld [smem:[#allocation36_spill]]  ;;  %s487_s18 = scalar_lea.sflag [#allocation5], %s1386_s7 }
 0x192   : > { %p1631_p5 = scmp.ne.s32.totalorder %s1612_s3, 0 }
 0x196   : > { %s712_s13 = sshll.u32 %s1629_s15, 3 }
 0x197   : > { %s502_s20 = scalar_lea.hbm %s1630_s19, %s712_s13  ;;  %s974_s29 = scalar_lea.hbm %s1630_s19, 16 }
 0x198   : > { %s506_s1 = sshll.u32 %s502_s20, 4  ;;  %s507_s1 = int_to_ptr.hbm [resolvable:$true] %s506_s1 }
 0x199   : > { %s968_s14 = sshra.s32 %s507_s1, 4  ;;  %s969_s14 = int_to_ptr.hbm [resolvable:$true] %s968_s14 }
 0x19a   : > { %s970_s5 = scalar_lea.hbm %s969_s14, 8  ;;  %p975_p3 = scmp.lt.s32.totalorder %s969_s14, %s1630_s19 }
 0x19b   : > { %p971_p0 = scmp.ne.s32.totalorder %s969_s14, %s970_s5  ;;  %p976_p6 = scmp.lt.s32.totalorder %s974_s29, %s970_s5 }
 0x19d   : > { %p972_p8 = pnand %p971_p0, %p1631_p5  ;;  %p977_p11 = por %p976_p6, %p975_p3 }
 0x19f   : > { %p973_p1 = pneg %p972_p8 }
 0x1a1   : > { %p978_p2 = pnand %p977_p11, %p973_p1 }
 0x1a3   : > { %981 = shalt.err (!%p978_p2)
}
 0x1a4   : > { %s1632_s7 = sld [smem:[#allocation21_spill]]  ;;  %s713_s9 = sshll.u32 %s1629_s15, 1 }
 0x1a5   : > { %724 = dma.vmem_to_hbm [thread:$0]  (%p1631_p5), %s505_s24, 128, %s507_s1, %s487_s18  }
 0x1a6   : > { %s520_s21 = sshll.u32 %s384_s6, 4  ;;  %s1634_s14 = sld [smem:[#allocation37_spill]]  ;;  %s521_s21 = int_to_ptr.vmem [resolvable:$true] %s520_s21 }
 0x1a7   : > { %s492_s3 = scalar_lea.sflag [#allocation11], %s382_s17 }
 0x1aa   : > { %s516_s13 = sadd.s32 %s1632_s7, %s713_s9 }
 0x1ab   : > { %s714_s16 = sshll.u32 %s516_s13, 3 }
 0x1ac   : > { %s518_s5 = scalar_lea.hbm %s1634_s14, %s714_s16  ;;  %s1002_s15 = scalar_lea.hbm %s1634_s14, 32 }
 0x1ad   : > { %s522_s4 = sshll.u32 %s518_s5, 4  ;;  %s523_s4 = int_to_ptr.hbm [resolvable:$true] %s522_s4 }
 0x1ae   : > { %s996_s26 = sshra.s32 %s523_s4, 4  ;;  %s997_s26 = int_to_ptr.hbm [resolvable:$true] %s996_s26 }
 0x1af   : > { %s998_s29 = scalar_lea.hbm %s997_s26, 8  ;;  %p1003_p0 = scmp.lt.s32.totalorder %s997_s26, %s1634_s14 }
 0x1b0   : > { %p999_p4 = scmp.ne.s32.totalorder %s997_s26, %s998_s29  ;;  %p1004_p5 = scmp.lt.s32.totalorder %s1002_s15, %s998_s29 }
 0x1b2   : > { %p1000_p7 = pnand %p999_p4, %p1355_p9  ;;  %p1005_p8 = por %p1004_p5, %p1003_p0 }
 0x1b4   : > { %p1001_p10 = pneg %p1000_p7 }
 0x1b6   : > { %p1006_p1 = pnand %p1005_p8, %p1001_p10 }
 0x1b8   : > { %1009 = shalt.err (!%p1006_p1)
}
 0x1b9   : > { %725 = dma.vmem_to_hbm [thread:$0]  (%p1355_p9), %s521_s21, 128, %s523_s4, %s492_s3  }
 0x1ba PF: > { %s1635_s17 = sld [smem:[#allocation19_spill]]  ;;  %p746_p3 = scmp.ge.s32.totalorder %s1136_s10, 2 }
 0x1bc   : > { %p739_p6 = pnand %p746_p3, %p1344_p13 }
 0x1be   : > { %p740_p11 = pneg %p739_p6 }
 0x1c0   : > { %s534_s23 = sand.u32 1, %s1635_s17  }
 0x1c1   : > { %s535_s27 = scalar_lea.sflag [#allocation5], %s534_s23 }
 0x1c2   : > { %1075 = dma.done.wait (%p740_p11), %s535_s27, 128  }
 0x1c3   : > { %1077 = vsyncadd (%p740_p11), %s535_s27, 4294967168  ;;  %s1637_s7 = sld [smem:[#allocation16_spill]]  ;;  %p742_p2 = pnand %p746_p3, %p1359_p12 }
 0x1c5   : > { %p743_p4 = pneg %p742_p2 }
 0x1c9   : > { %s544_s13 = sand.u32 1, %s1637_s7  }
 0x1ca   : > { %s545_s30 = scalar_lea.sflag [#allocation11], %s544_s13 }
 0x1cb   : > { %1079 = dma.done.wait (%p743_p4), %s545_s30, 128  }
 0x1cc   : > { %1081 = vsyncadd (%p743_p4), %s545_s30, 4294967168  ;;  %s29_s10 = sadd.s32 1, %s1136_s10   ;;  %s1640_s16 = sld [smem:[#allocation17_spill]] }
 0x1cd   : > { %p1511_p9 = scmp.ge.s32.totalorder %s29_s10, 6   ;;  %s1641_s23 = sld [smem:[#allocation30_spill]] }
 0x1ce   : > { %s1642_s12 = sld [smem:[#allocation18_spill]]  ;;  %s1650_s21 = smov %s1088_s22 }
 0x1cf   : > { %s1643_s26 = sld [smem:[#allocation27_spill]]  ;;  %s1652_s24 = smov %s1100_s25 }
 0x1d0   : > { %s1644_s20 = sld [smem:[#allocation20_spill]]  ;;  %s1654_s27 = smov %s1112_s28 }
 0x1d1   : > { %s1645_s29 = sld [smem:[#allocation28_spill]]  ;;  %s1656_s30 = smov %s1128_s8 }
 0x1d2   : > { %s1646_s7 = sld [smem:[#allocation23_spill]]  ;;  %s1651_s22 = smov %s1640_s16 }
 0x1d3   : > { %s1647_s5 = sld [smem:[#allocation24_spill]] }
 0x1d4   : > { %s1648_s9 = sld [smem:[#allocation25_spill]]  ;;  %s1653_s25 = smov %s1642_s12 }
 0x1d5   :  { %28 = sbr.rel (!%p1511_p9) target bundleno = 20 (0x14), region = 137 }
 0x1d6   : > { %s1655_s28 = smov %s1644_s20 }
 0x1d9   : > { %s1657_s8 = smov %s1647_s5 }
 0x1da   :  { %551 = vsyncpa [#allocation4], 1 }
 0x1db   :  { %553 = vsyncpa [#allocation4 + $0x1], 1 }
 0x1dc   :  { %554 = vsyncpa [#allocation7], 1 }
 0x1dd   :  { %556 = vsyncpa [#allocation7 + $0x1], 1 }
 0x1de   :  { %557 = vsyncpa [#allocation5], 1 }
 0x1df   :  { %559 = vsyncpa [#allocation5 + $0x1], 1 }
 0x1e0   :  { %560 = vsyncpa [#allocation11], 1 }
 0x1e1   :  { %562 = vsyncpa [#allocation11 + $0x1], 1 }

</bundles_post_ra>
